<compile_context>
chip_gen: v7x
topology: tpu7x:2x2x1
jax: 0.10.0
libtpu: 0.0.40
codegen_flags: <defaults>
</compile_context>

<pallas_src>
import functools

import jax
import jax.numpy as jnp
import numpy as np
from jax import lax
from jax.experimental import pallas as pl
from jax.experimental.pallas import tpu as pltpu


def _softplus(x):
    # PyTorch Softplus (beta=1, threshold=20): x for x > 20, log1p(exp(x)) else.
    return jnp.where(x > 20.0, x, jnp.log1p(jnp.exp(jnp.minimum(x, 20.0))))


def mean_var_rnn_kernel(x_ref, h0_ref, wih_ref, whh_ref, brnn_ref,
                        wmv_ref, bmv_ref, out_ref, hs_scr, *, T, B, P):
    # TODO(synk): for non-toy T, chunk the time axis (grid=(ceil(T/Tc),) with
    # an h carry in VMEM scratch) so the head matmul + output DMA of chunk c
    # pipeline behind the serial recurrence of chunk c+1, and optionally drive
    # the MXU explicitly (pltpu.matmul_push_rhs once + matmul_acc_lhs/pop per
    # step) to keep W_hh resident in the MXU staging registers.

    # 1) Hoisted input projection for ALL time steps + fused RNN bias:
    #    one big (T*B, D_in) @ (D_in, H) bf16 matmul with f32 accumulation.
    xw = jnp.dot(x_ref[...], wih_ref[...], preferred_element_type=jnp.float32)
    hs_scr[...] = xw + brnn_ref[...]

    # 2) Sequential recurrence: only (B,H)@(H,H) + tanh on the serial path.
    #    W_hh^T (bf16) is read once and kept live across all T steps.
    #    hs_scr holds the precomputed input projections (f32) and is
    #    overwritten in place with h_t (f32).
    whh = whh_ref[...]

    def step(t, h_prev):
        i = pl.multiple_of(t * B, B)
        pre = hs_scr[pl.ds(i, B), :] + jnp.dot(
            h_prev.astype(jnp.bfloat16), whh,
            preferred_element_type=jnp.float32)
        h = jnp.tanh(pre)                      # f32 elementwise
        hs_scr[pl.ds(i, B), :] = h
        return h

    unroll = True if T <= 8 else 8             # cap unroll for real seq lengths
    lax.fori_loop(0, T, step, h0_ref[...].astype(jnp.float32), unroll=unroll)

    # 3) Fused mean/var heads: single (T*B, H) @ (H, 2P) bf16 matmul (f32 acc),
    #    then a lane-masked softplus on the var half; one lane-dense combined
    #    store.  (At 2P=32 the wasted transcendentals on the mean half are
    #    off the serial path and effectively free.)
    proj = jnp.dot(hs_scr[...].astype(jnp.bfloat16), wmv_ref[...],
                   preferred_element_type=jnp.float32) + bmv_ref[...]
    col = lax.broadcasted_iota(jnp.int32, proj.shape, 1)
    out_ref[...] = jnp.where(col < P, proj, _softplus(proj)).astype(out_ref.dtype)


@jax.jit
def mean_var_rnn_forward(mean_input, var_input, h_0, params):
    """mean_input, var_input: (T, B, d) each; h_0: (1, B, H)."""
    comb = jnp.concatenate((mean_input, var_input), axis=2)   # (T, B, D_in)
    T, B, D_in = comb.shape
    H = h_0.shape[2]
    P = params["w_mean"].shape[0]

    # Pad batch to a sublane multiple (>= 8); padded rows are sliced off below.
    BP = max(8, ((B + 7) // 8) * 8)
    h0 = h_0[0]
    if BP != B:
        comb = jnp.pad(comb, ((0, 0), (0, BP - B), (0, 0)))
        h0 = jnp.pad(h0, ((0, BP - B), (0, 0)))

    # bf16 MXU operands; biases / initial state / accumulation stay f32.
    x2d = comb.reshape(T * BP, D_in).astype(jnp.bfloat16)

    # Wrapper-side weight prep (PyTorch (out,in) -> (in,out)); fuse biases and
    # the two output heads.
    wih_t = params["w_ih"].T.astype(jnp.bfloat16)                   # (D_in, H)
    whh_t = params["w_hh"].T.astype(jnp.bfloat16)                   # (H, H)
    b_rnn = (params["b_ih"] + params["b_hh"]).reshape(1, H)         # (1, H) f32
    wmv = jnp.concatenate((params["w_mean"].T, params["w_var"].T),
                          axis=1).astype(jnp.bfloat16)              # (H, 2P)
    bmv = jnp.concatenate((params["b_mean"], params["b_var"])).reshape(1, 2 * P)

    kern = functools.partial(mean_var_rnn_kernel, T=T, B=BP, P=P)

    # Size the scoped VMEM limit to the real all-resident footprint
    # (grid=(1,) means nothing is pipelined); keep headroom, stay safe on v7x.
    inputs = (x2d, h0, wih_t, whh_t, b_rnn, wmv, bmv)
    out_bytes = T * BP * 2 * P * 4
    scratch_bytes = T * BP * H * 4
    footprint = (2 * (sum(int(np.prod(a.shape)) * a.dtype.itemsize
                          for a in inputs) + out_bytes) + scratch_bytes)
    vmem_limit = int(min(120 << 20, max(footprint + (4 << 20), 8 << 20)))

    def full(shape):
        return pl.BlockSpec(shape, lambda i: tuple(0 for _ in shape))

    grid_spec = pltpu.PrefetchScalarGridSpec(
        num_scalar_prefetch=0,
        grid=(1,),
        in_specs=[
            full((T * BP, D_in)),   # x (all time steps, flattened), bf16
            full((BP, H)),          # h_0, f32
            full((D_in, H)),        # W_ih^T, bf16
            full((H, H)),           # W_hh^T, bf16
            full((1, H)),           # b_ih + b_hh, f32
            full((H, 2 * P)),       # [W_mean^T | W_var^T], bf16
            full((1, 2 * P)),       # [b_mean | b_var], f32
        ],
        # NOTE: 2P=32 / H=32 are below 128 lanes, so stores are masked; at
        # this output size it's noise.  If P/H scale up, keep them multiples
        # of 128 (do NOT add in-kernel reshapes to fake lane density).
        out_specs=full((T * BP, 2 * P)),
        scratch_shapes=[pltpu.VMEM((T * BP, H), jnp.float32)],
    )

    out = pl.pallas_call(
        kern,
        grid_spec=grid_spec,
        out_shape=jax.ShapeDtypeStruct((T * BP, 2 * P), jnp.float32),
        compiler_params=pltpu.CompilerParams(
            dimension_semantics=("arbitrary",),   # single sequential invocation
            vmem_limit_bytes=vmem_limit),
    )(x2d, h0, wih_t, whh_t, b_rnn, wmv, bmv)

    out = out.reshape(T, BP, 2 * P)[:, :B, :]
    return out[..., :P], out[..., P:]


def reference_forward(mean_input, var_input, h_0, params):
    """Pure-JAX (f32) reference of the PyTorch module forward."""
    x = jnp.concatenate((mean_input, var_input), axis=2)
    h = h_0[0]

    def step(h, x_t):
        h_new = jnp.tanh(x_t @ params["w_ih"].T + params["b_ih"]
                         + h @ params["w_hh"].T + params["b_hh"])
        return h_new, h_new

    _, hs = jax.lax.scan(step, h, x)                      # (T, B, H)
    mean = hs @ params["w_mean"].T + params["b_mean"]
    var_pre = hs @ params["w_var"].T + params["b_var"]
    var = jnp.where(var_pre > 20.0, var_pre,
                    jnp.log1p(jnp.exp(jnp.minimum(var_pre, 20.0))))
    return mean, var


if __name__ == "__main__":
    # Small shapes: seq T=8, batch B=4, mean/var feature dim d=8
    # -> p_input_dim (after concat) = 16, p_hidden_dim = 32, p_output_dim = 16.
    T, B, d = 8, 4, 8
    D_in, H, P = 2 * d, 32, 16

    key = jax.random.PRNGKey(0)
    keys = jax.random.split(key, 12)
    s = 1.0 / np.sqrt(H)   # PyTorch-style uniform init bound

    params = {
        "w_ih": jax.random.uniform(keys[0], (H, D_in), jnp.float32, -s, s),
        "w_hh": jax.random.uniform(keys[1], (H, H), jnp.float32, -s, s),
        "b_ih": jax.random.uniform(keys[2], (H,), jnp.float32, -s, s),
        "b_hh": jax.random.uniform(keys[3], (H,), jnp.float32, -s, s),
        "w_mean": jax.random.uniform(keys[4], (P, H), jnp.float32, -s, s),
        "b_mean": jax.random.uniform(keys[5], (P,), jnp.float32, -s, s),
        "w_var": jax.random.uniform(keys[6], (P, H), jnp.float32, -s, s),
        "b_var": jax.random.uniform(keys[7], (P,), jnp.float32, -s, s),
    }

    mean_input = jax.random.normal(keys[8], (T, B, d), jnp.float32)
    var_input = jax.random.normal(keys[9], (T, B, d), jnp.float32) ** 2
    h_0 = jax.random.normal(keys[10], (1, B, H), jnp.float32) * 0.1

    mean_out, var_out = mean_var_rnn_forward(mean_input, var_input, h_0, params)
    jax.block_until_ready((mean_out, var_out))

    ref_mean, ref_var = reference_forward(mean_input, var_input, h_0, params)
    # bf16 MXU operands + f32 accumulation/elementwise: tolerance 1e-2 class.
    np.testing.assert_allclose(np.asarray(mean_out), np.asarray(ref_mean),
                               rtol=1e-2, atol=2e-2)
    np.testing.assert_allclose(np.asarray(var_out), np.asarray(ref_var),
                               rtol=1e-2, atol=2e-2)

    print("KERNEL_OK")
</pallas_src>

<mosaic_0001>
module attributes {stable_mosaic.version = 11 : i64} {
  func.func @mean_var_rnn_kernel(%arg0: i32, %arg1: memref<64x16xbf16, #tpu.memory_space<vmem>>, %arg2: memref<8x32xf32, #tpu.memory_space<vmem>>, %arg3: memref<16x32xbf16, #tpu.memory_space<vmem>>, %arg4: memref<32x32xbf16, #tpu.memory_space<vmem>>, %arg5: memref<1x32xf32, #tpu.memory_space<vmem>>, %arg6: memref<32x32xbf16, #tpu.memory_space<vmem>>, %arg7: memref<1x32xf32, #tpu.memory_space<vmem>>, %arg8: memref<64x32xf32, #tpu.memory_space<vmem>>, %arg9: memref<64x32xf32, #tpu.memory_space<vmem>>) attributes {dimension_semantics = [#tpu.dimension_semantics<arbitrary>], iteration_bounds = array<i64: 1>, scalar_prefetch = 0 : i64, scratch_operands = 1 : i64, tpu.core_type = #tpu.core_type<tc>, window_params = [{pipeline_mode = #tpu.pipeline_mode<synchronous>, transform_indices = @transform_0, window_bounds = array<i64: 64, 16>}, {pipeline_mode = #tpu.pipeline_mode<synchronous>, transform_indices = @transform_1, window_bounds = array<i64: 8, 32>}, {pipeline_mode = #tpu.pipeline_mode<synchronous>, transform_indices = @transform_2, window_bounds = array<i64: 16, 32>}, {pipeline_mode = #tpu.pipeline_mode<synchronous>, transform_indices = @transform_3, window_bounds = array<i64: 32, 32>}, {pipeline_mode = #tpu.pipeline_mode<synchronous>, transform_indices = @transform_4, window_bounds = array<i64: 1, 32>}, {pipeline_mode = #tpu.pipeline_mode<synchronous>, transform_indices = @transform_5, window_bounds = array<i64: 32, 32>}, {pipeline_mode = #tpu.pipeline_mode<synchronous>, transform_indices = @transform_6, window_bounds = array<i64: 1, 32>}, {pipeline_mode = #tpu.pipeline_mode<synchronous>, transform_indices = @transform_7, window_bounds = array<i64: 64, 32>}]} {
    %c0 = arith.constant 0 : index
    %c0_0 = arith.constant 0 : index
    %0 = vector.load %arg1[%c0, %c0_0] : memref<64x16xbf16, #tpu.memory_space<vmem>>, vector<64x16xbf16>
    %c0_1 = arith.constant 0 : index
    %c0_2 = arith.constant 0 : index
    %1 = vector.load %arg3[%c0_1, %c0_2] : memref<16x32xbf16, #tpu.memory_space<vmem>>, vector<16x32xbf16>
    %cst = arith.constant dense<0.000000e+00> : vector<64x32xf32>
    %2 = tpu.matmul %0, %1, %cst {dimension_numbers = #tpu.dot_dimension_numbers<[1], [0], [0], [1], [0, 0, 1, 1], [], []>} : vector<64x16xbf16>, vector<16x32xbf16>, vector<64x32xf32> -> vector<64x32xf32>
    %c0_3 = arith.constant 0 : index
    %c0_4 = arith.constant 0 : index
    %3 = vector.load %arg5[%c0_3, %c0_4] : memref<1x32xf32, #tpu.memory_space<vmem>>, vector<1x32xf32>
    %4 = vector.broadcast %3 : vector<1x32xf32> to vector<64x32xf32>
    %5 = arith.addf %2, %4 : vector<64x32xf32>
    %c0_5 = arith.constant 0 : index
    %c0_6 = arith.constant 0 : index
    %6 = vector.load %arg9[%c0_5, %c0_6] : memref<64x32xf32, #tpu.memory_space<vmem>>, vector<64x32xf32>
    tpu.vector_store %arg9[%c0_5, %c0_6], %5 {strides = array<i32>} : memref<64x32xf32, #tpu.memory_space<vmem>>, vector<64x32xf32>,
    %c0_7 = arith.constant 0 : index
    %c0_8 = arith.constant 0 : index
    %7 = vector.load %arg4[%c0_7, %c0_8] : memref<32x32xbf16, #tpu.memory_space<vmem>>, vector<32x32xbf16>
    %c0_9 = arith.constant 0 : index
    %c0_10 = arith.constant 0 : index
    %8 = vector.load %arg2[%c0_9, %c0_10] : memref<8x32xf32, #tpu.memory_space<vmem>>, vector<8x32xf32>
    %c0_i32 = arith.constant 0 : i32
    %c8_i32 = arith.constant 8 : i32
    %9 = arith.muli %c0_i32, %c8_i32 : i32
    %10 = tpu.assume_multiple %9, 8 : i32
    %11 = arith.index_cast %10 : i32 to index
    %c0_11 = arith.constant 0 : index
    %12 = vector.load %arg9[%11, %c0_11] : memref<64x32xf32, #tpu.memory_space<vmem>>, vector<8x32xf32>
    %13 = arith.truncf %8 : vector<8x32xf32> to vector<8x32xbf16>
    %cst_12 = arith.constant dense<0.000000e+00> : vector<8x32xf32>
    %14 = tpu.matmul %13, %7, %cst_12 {dimension_numbers = #tpu.dot_dimension_numbers<[1], [0], [0], [1], [0, 0, 1, 1], [], []>} : vector<8x32xbf16>, vector<32x32xbf16>, vector<8x32xf32> -> vector<8x32xf32>
    %15 = arith.addf %12, %14 : vector<8x32xf32>
    %16 = math.tanh %15 : vector<8x32xf32>
    %17 = arith.index_cast %10 : i32 to index
    %c0_13 = arith.constant 0 : index
    %18 = vector.load %arg9[%17, %c0_13] : memref<64x32xf32, #tpu.memory_space<vmem>>, vector<8x32xf32>
    tpu.vector_store %arg9[%17, %c0_13], %16 {strides = array<i32>} : memref<64x32xf32, #tpu.memory_space<vmem>>, vector<8x32xf32>,
    %c1_i32 = arith.constant 1 : i32
    %c8_i32_14 = arith.constant 8 : i32
    %19 = arith.muli %c1_i32, %c8_i32_14 : i32
    %20 = tpu.assume_multiple %19, 8 : i32
    %21 = arith.index_cast %20 : i32 to index
    %c0_15 = arith.constant 0 : index
    %22 = vector.load %arg9[%21, %c0_15] : memref<64x32xf32, #tpu.memory_space<vmem>>, vector<8x32xf32>
    %23 = arith.truncf %16 : vector<8x32xf32> to vector<8x32xbf16>
    %cst_16 = arith.constant dense<0.000000e+00> : vector<8x32xf32>
    %24 = tpu.matmul %23, %7, %cst_16 {dimension_numbers = #tpu.dot_dimension_numbers<[1], [0], [0], [1], [0, 0, 1, 1], [], []>} : vector<8x32xbf16>, vector<32x32xbf16>, vector<8x32xf32> -> vector<8x32xf32>
    %25 = arith.addf %22, %24 : vector<8x32xf32>
    %26 = math.tanh %25 : vector<8x32xf32>
    %27 = arith.index_cast %20 : i32 to index
    %c0_17 = arith.constant 0 : index
    %28 = vector.load %arg9[%27, %c0_17] : memref<64x32xf32, #tpu.memory_space<vmem>>, vector<8x32xf32>
    tpu.vector_store %arg9[%27, %c0_17], %26 {strides = array<i32>} : memref<64x32xf32, #tpu.memory_space<vmem>>, vector<8x32xf32>,
    %c2_i32 = arith.constant 2 : i32
    %c8_i32_18 = arith.constant 8 : i32
    %29 = arith.muli %c2_i32, %c8_i32_18 : i32
    %30 = tpu.assume_multiple %29, 8 : i32
    %31 = arith.index_cast %30 : i32 to index
    %c0_19 = arith.constant 0 : index
    %32 = vector.load %arg9[%31, %c0_19] : memref<64x32xf32, #tpu.memory_space<vmem>>, vector<8x32xf32>
    %33 = arith.truncf %26 : vector<8x32xf32> to vector<8x32xbf16>
    %cst_20 = arith.constant dense<0.000000e+00> : vector<8x32xf32>
    %34 = tpu.matmul %33, %7, %cst_20 {dimension_numbers = #tpu.dot_dimension_numbers<[1], [0], [0], [1], [0, 0, 1, 1], [], []>} : vector<8x32xbf16>, vector<32x32xbf16>, vector<8x32xf32> -> vector<8x32xf32>
    %35 = arith.addf %32, %34 : vector<8x32xf32>
    %36 = math.tanh %35 : vector<8x32xf32>
    %37 = arith.index_cast %30 : i32 to index
    %c0_21 = arith.constant 0 : index
    %38 = vector.load %arg9[%37, %c0_21] : memref<64x32xf32, #tpu.memory_space<vmem>>, vector<8x32xf32>
    tpu.vector_store %arg9[%37, %c0_21], %36 {strides = array<i32>} : memref<64x32xf32, #tpu.memory_space<vmem>>, vector<8x32xf32>,
    %c3_i32 = arith.constant 3 : i32
    %c8_i32_22 = arith.constant 8 : i32
    %39 = arith.muli %c3_i32, %c8_i32_22 : i32
    %40 = tpu.assume_multiple %39, 8 : i32
    %41 = arith.index_cast %40 : i32 to index
    %c0_23 = arith.constant 0 : index
    %42 = vector.load %arg9[%41, %c0_23] : memref<64x32xf32, #tpu.memory_space<vmem>>, vector<8x32xf32>
    %43 = arith.truncf %36 : vector<8x32xf32> to vector<8x32xbf16>
    %cst_24 = arith.constant dense<0.000000e+00> : vector<8x32xf32>
    %44 = tpu.matmul %43, %7, %cst_24 {dimension_numbers = #tpu.dot_dimension_numbers<[1], [0], [0], [1], [0, 0, 1, 1], [], []>} : vector<8x32xbf16>, vector<32x32xbf16>, vector<8x32xf32> -> vector<8x32xf32>
    %45 = arith.addf %42, %44 : vector<8x32xf32>
    %46 = math.tanh %45 : vector<8x32xf32>
    %47 = arith.index_cast %40 : i32 to index
    %c0_25 = arith.constant 0 : index
    %48 = vector.load %arg9[%47, %c0_25] : memref<64x32xf32, #tpu.memory_space<vmem>>, vector<8x32xf32>
    tpu.vector_store %arg9[%47, %c0_25], %46 {strides = array<i32>} : memref<64x32xf32, #tpu.memory_space<vmem>>, vector<8x32xf32>,
    %c4_i32 = arith.constant 4 : i32
    %c8_i32_26 = arith.constant 8 : i32
    %49 = arith.muli %c4_i32, %c8_i32_26 : i32
    %50 = tpu.assume_multiple %49, 8 : i32
    %51 = arith.index_cast %50 : i32 to index
    %c0_27 = arith.constant 0 : index
    %52 = vector.load %arg9[%51, %c0_27] : memref<64x32xf32, #tpu.memory_space<vmem>>, vector<8x32xf32>
    %53 = arith.truncf %46 : vector<8x32xf32> to vector<8x32xbf16>
    %cst_28 = arith.constant dense<0.000000e+00> : vector<8x32xf32>
    %54 = tpu.matmul %53, %7, %cst_28 {dimension_numbers = #tpu.dot_dimension_numbers<[1], [0], [0], [1], [0, 0, 1, 1], [], []>} : vector<8x32xbf16>, vector<32x32xbf16>, vector<8x32xf32> -> vector<8x32xf32>
    %55 = arith.addf %52, %54 : vector<8x32xf32>
    %56 = math.tanh %55 : vector<8x32xf32>
    %57 = arith.index_cast %50 : i32 to index
    %c0_29 = arith.constant 0 : index
    %58 = vector.load %arg9[%57, %c0_29] : memref<64x32xf32, #tpu.memory_space<vmem>>, vector<8x32xf32>
    tpu.vector_store %arg9[%57, %c0_29], %56 {strides = array<i32>} : memref<64x32xf32, #tpu.memory_space<vmem>>, vector<8x32xf32>,
    %c5_i32 = arith.constant 5 : i32
    %c8_i32_30 = arith.constant 8 : i32
    %59 = arith.muli %c5_i32, %c8_i32_30 : i32
    %60 = tpu.assume_multiple %59, 8 : i32
    %61 = arith.index_cast %60 : i32 to index
    %c0_31 = arith.constant 0 : index
    %62 = vector.load %arg9[%61, %c0_31] : memref<64x32xf32, #tpu.memory_space<vmem>>, vector<8x32xf32>
    %63 = arith.truncf %56 : vector<8x32xf32> to vector<8x32xbf16>
    %cst_32 = arith.constant dense<0.000000e+00> : vector<8x32xf32>
    %64 = tpu.matmul %63, %7, %cst_32 {dimension_numbers = #tpu.dot_dimension_numbers<[1], [0], [0], [1], [0, 0, 1, 1], [], []>} : vector<8x32xbf16>, vector<32x32xbf16>, vector<8x32xf32> -> vector<8x32xf32>
    %65 = arith.addf %62, %64 : vector<8x32xf32>
    %66 = math.tanh %65 : vector<8x32xf32>
    %67 = arith.index_cast %60 : i32 to index
    %c0_33 = arith.constant 0 : index
    %68 = vector.load %arg9[%67, %c0_33] : memref<64x32xf32, #tpu.memory_space<vmem>>, vector<8x32xf32>
    tpu.vector_store %arg9[%67, %c0_33], %66 {strides = array<i32>} : memref<64x32xf32, #tpu.memory_space<vmem>>, vector<8x32xf32>,
    %c6_i32 = arith.constant 6 : i32
    %c8_i32_34 = arith.constant 8 : i32
    %69 = arith.muli %c6_i32, %c8_i32_34 : i32
    %70 = tpu.assume_multiple %69, 8 : i32
    %71 = arith.index_cast %70 : i32 to index
    %c0_35 = arith.constant 0 : index
    %72 = vector.load %arg9[%71, %c0_35] : memref<64x32xf32, #tpu.memory_space<vmem>>, vector<8x32xf32>
    %73 = arith.truncf %66 : vector<8x32xf32> to vector<8x32xbf16>
    %cst_36 = arith.constant dense<0.000000e+00> : vector<8x32xf32>
    %74 = tpu.matmul %73, %7, %cst_36 {dimension_numbers = #tpu.dot_dimension_numbers<[1], [0], [0], [1], [0, 0, 1, 1], [], []>} : vector<8x32xbf16>, vector<32x32xbf16>, vector<8x32xf32> -> vector<8x32xf32>
    %75 = arith.addf %72, %74 : vector<8x32xf32>
    %76 = math.tanh %75 : vector<8x32xf32>
    %77 = arith.index_cast %70 : i32 to index
    %c0_37 = arith.constant 0 : index
    %78 = vector.load %arg9[%77, %c0_37] : memref<64x32xf32, #tpu.memory_space<vmem>>, vector<8x32xf32>
    tpu.vector_store %arg9[%77, %c0_37], %76 {strides = array<i32>} : memref<64x32xf32, #tpu.memory_space<vmem>>, vector<8x32xf32>,
    %c7_i32 = arith.constant 7 : i32
    %c8_i32_38 = arith.constant 8 : i32
    %79 = arith.muli %c7_i32, %c8_i32_38 : i32
    %80 = tpu.assume_multiple %79, 8 : i32
    %81 = arith.index_cast %80 : i32 to index
    %c0_39 = arith.constant 0 : index
    %82 = vector.load %arg9[%81, %c0_39] : memref<64x32xf32, #tpu.memory_space<vmem>>, vector<8x32xf32>
    %83 = arith.truncf %76 : vector<8x32xf32> to vector<8x32xbf16>
    %cst_40 = arith.constant dense<0.000000e+00> : vector<8x32xf32>
    %84 = tpu.matmul %83, %7, %cst_40 {dimension_numbers = #tpu.dot_dimension_numbers<[1], [0], [0], [1], [0, 0, 1, 1], [], []>} : vector<8x32xbf16>, vector<32x32xbf16>, vector<8x32xf32> -> vector<8x32xf32>
    %85 = arith.addf %82, %84 : vector<8x32xf32>
    %86 = math.tanh %85 : vector<8x32xf32>
    %87 = arith.index_cast %80 : i32 to index
    %c0_41 = arith.constant 0 : index
    %88 = vector.load %arg9[%87, %c0_41] : memref<64x32xf32, #tpu.memory_space<vmem>>, vector<8x32xf32>
    tpu.vector_store %arg9[%87, %c0_41], %86 {strides = array<i32>} : memref<64x32xf32, #tpu.memory_space<vmem>>, vector<8x32xf32>,
    %c8_i32_42 = arith.constant 8 : i32
    %c0_43 = arith.constant 0 : index
    %c0_44 = arith.constant 0 : index
    %89 = vector.load %arg9[%c0_43, %c0_44] : memref<64x32xf32, #tpu.memory_space<vmem>>, vector<64x32xf32>
    %90 = arith.truncf %89 : vector<64x32xf32> to vector<64x32xbf16>
    %c0_45 = arith.constant 0 : index
    %c0_46 = arith.constant 0 : index
    %91 = vector.load %arg6[%c0_45, %c0_46] : memref<32x32xbf16, #tpu.memory_space<vmem>>, vector<32x32xbf16>
    %cst_47 = arith.constant dense<0.000000e+00> : vector<64x32xf32>
    %92 = tpu.matmul %90, %91, %cst_47 {dimension_numbers = #tpu.dot_dimension_numbers<[1], [0], [0], [1], [0, 0, 1, 1], [], []>} : vector<64x32xbf16>, vector<32x32xbf16>, vector<64x32xf32> -> vector<64x32xf32>
    %c0_48 = arith.constant 0 : index
    %c0_49 = arith.constant 0 : index
    %93 = vector.load %arg7[%c0_48, %c0_49] : memref<1x32xf32, #tpu.memory_space<vmem>>, vector<1x32xf32>
    %94 = vector.broadcast %93 : vector<1x32xf32> to vector<64x32xf32>
    %95 = arith.addf %92, %94 : vector<64x32xf32>
    %96 = tpu.iota {dimensions = array<i32: 1>} : vector<64x32xi32>
    %c16_i32 = arith.constant 16 : i32
    %97 = vector.broadcast %c16_i32 : i32 to vector<64x32xi32>
    %98 = arith.cmpi slt, %96, %97 : vector<64x32xi32>
    %cst_50 = arith.constant 2.000000e+01 : f32
    %99 = vector.broadcast %cst_50 : f32 to vector<64x32xf32>
    %100 = arith.cmpf ogt, %95, %99 : vector<64x32xf32>
    %cst_51 = arith.constant 2.000000e+01 : f32
    %101 = vector.broadcast %cst_51 : f32 to vector<64x32xf32>
    %102 = arith.minimumf %95, %101 : vector<64x32xf32>
    %103 = math.exp %102 : vector<64x32xf32>
    %104 = math.log1p %103 : vector<64x32xf32>
    %105 = arith.select %100, %95, %104 : vector<64x32xi1>, vector<64x32xf32>
    %106 = arith.select %98, %95, %105 : vector<64x32xi1>, vector<64x32xf32>
    %c0_52 = arith.constant 0 : index
    %c0_53 = arith.constant 0 : index
    %107 = vector.load %arg8[%c0_52, %c0_53] : memref<64x32xf32, #tpu.memory_space<vmem>>, vector<64x32xf32>
    tpu.vector_store %arg8[%c0_52, %c0_53], %106 {strides = array<i32>} : memref<64x32xf32, #tpu.memory_space<vmem>>, vector<64x32xf32>,
    return
  }
  func.func @transform_0(%arg0: i32) -> (i32, i32) {
    %c0_i32 = arith.constant 0 : i32
    %c0_i32_0 = arith.constant 0 : i32
    %c0_i32_1 = arith.constant 0 : i32
    return %c0_i32, %c0_i32_0 : i32, i32
  }
  func.func @transform_1(%arg0: i32) -> (i32, i32) {
    %c0_i32 = arith.constant 0 : i32
    %c0_i32_0 = arith.constant 0 : i32
    %c0_i32_1 = arith.constant 0 : i32
    return %c0_i32, %c0_i32_0 : i32, i32
  }
  func.func @transform_2(%arg0: i32) -> (i32, i32) {
    %c0_i32 = arith.constant 0 : i32
    %c0_i32_0 = arith.constant 0 : i32
    %c0_i32_1 = arith.constant 0 : i32
    return %c0_i32, %c0_i32_0 : i32, i32
  }
  func.func @transform_3(%arg0: i32) -> (i32, i32) {
    %c0_i32 = arith.constant 0 : i32
    %c0_i32_0 = arith.constant 0 : i32
    %c0_i32_1 = arith.constant 0 : i32
    return %c0_i32, %c0_i32_0 : i32, i32
  }
  func.func @transform_4(%arg0: i32) -> (i32, i32) {
    %c0_i32 = arith.constant 0 : i32
    %c0_i32_0 = arith.constant 0 : i32
    %c0_i32_1 = arith.constant 0 : i32
    return %c0_i32, %c0_i32_0 : i32, i32
  }
  func.func @transform_5(%arg0: i32) -> (i32, i32) {
    %c0_i32 = arith.constant 0 : i32
    %c0_i32_0 = arith.constant 0 : i32
    %c0_i32_1 = arith.constant 0 : i32
    return %c0_i32, %c0_i32_0 : i32, i32
  }
  func.func @transform_6(%arg0: i32) -> (i32, i32) {
    %c0_i32 = arith.constant 0 : i32
    %c0_i32_0 = arith.constant 0 : i32
    %c0_i32_1 = arith.constant 0 : i32
    return %c0_i32, %c0_i32_0 : i32, i32
  }
  func.func @transform_7(%arg0: i32) -> (i32, i32) {
    %c0_i32 = arith.constant 0 : i32
    %c0_i32_0 = arith.constant 0 : i32
    %c0_i32_1 = arith.constant 0 : i32
    return %c0_i32, %c0_i32_0 : i32, i32
  }
}

</mosaic_0001>

<bundles_post_ra>
// kernel: mean_var_rnn_forward.1
= control target key start
LH: loop header
LB: loop body
LE: loop exit
PB: predicated region body
PF: predicated region fallthrough
CT: control target
= control target key end

     0   :  { %vm70_vm0 = vcmask 130048   ;;  %v1021_v5 = vmov 0.0   ;;  %vm1022_vm1 = vmmov 0   ;;  %vm148_vm2 = vcmask 261120   ;;  %s1304_s2 = inlined_call_operand.vmem [shape: bf16[16,32], index: 2, kind: input, shape index: {}]   ;;  %s1305_s0 = inlined_call_operand.vmem [shape: bf16[64,16], index: 0, kind: input, shape index: {}]   ;;  %s1306_s3 = inlined_call_operand.vmem [shape: bf16[32,32], index: 3, kind: input, shape index: {}]   ;;  %s1307_s1 = inlined_call_operand.vmem [shape: f32[8,32], index: 1, kind: input, shape index: {}]   ;;  %s1308_s4 = inlined_call_operand.vmem [shape: f32[1,32], index: 4, kind: input, shape index: {}]   ;;  %s1309_s5 = inlined_call_operand.vmem [shape: bf16[32,32], index: 5, kind: input, shape index: {}]   ;;  %s1310_s6 = inlined_call_operand.vmem [shape: f32[1,32], index: 6, kind: input, shape index: {}]   ;;  %s1311_s7 = inlined_call_operand.vmem [shape: f32[64,32], index: 7, kind: output, shape index: {}]  }
   0x1   :  { %v964_v0 = vld [vmem:[%s1304_s2] sm:$0xff]   ;;  %v966_v2 = vld [vmem:[%s1305_s0 + $0x10] sm:$0xff]   ;;  %v967_v3 = vld [vmem:[%s1305_s0 + $0x8] sm:$0xff]  }
   0x2   :  { %v965_v1 = vld [vmem:[%s1305_s0] sm:$0xff]   ;;  %874 = vmatprep.subr.bf16.mxu0 %v964_v0  ;;  %960 = vmatprep.subr.bf16.mxu1 %v964_v0  ;;  %v968_v4 = vld [vmem:[%s1305_s0 + $0x18] sm:$0xff]   ;;  %v1093_v7 = vld [vmem:[%s1306_s3 + $0x8] sm:$0xff]  }
   0x3   :  { %875 = vmatpush3.bf16.msra.mxu0 %v964_v0  ;;  %961 = vmatpush3.bf16.msra.mxu1 %v964_v0  ;;  %v1084_v6 = vld [vmem:[%s1306_s3] sm:$0xff]  }
   0x4   :  { %876 = vmatprep.mubr.msk.bf16.mxu0 %vm70_vm0, %v965_v1  ;;  %880 = vmatprep.mubr.msk.bf16.mxu1 %vm70_vm0, %v966_v2  ;;  %v161_v8 = vld [vmem:[%s1307_s1] sm:$0xff] }
   0x5   :  { %884 = vmatprep.subr.bf16.mxu1 %v1021_v5  ;;  %900 = vmatprep.subr.bf16.mxu0 %v1021_v5  ;;  %v163_v9 = vpack.c.bf16 %v161_v8, %v161_v8  ;;  %v812_v10 = vld [vmem:[%s1308_s4] ss:$0 sm:$0xff] }
   0x6   :  { %877 = vmatmul.mubr.msk.bf16.vlgmr.msra.gmra.mrb[0].mxu0 %vm70_vm0, %v967_v3  ;;  %881 = vmatmul.mubr.msk.bf16.vlgmr.msra.gmra.mrb[0].mxu1 %vm70_vm0, %v968_v4  ;;  %v971_v3 = vld [vmem:[%s1309_s5] sm:$0xff]  }
   0x7   :  { %885 = vmatpush3.bf16.msra.mxu1 %v1084_v6  ;;  %888 = vmatprep.mubr.msk.bf16.mxu1 %vm1022_vm1, %v1021_v5 }
   0x8   :  { %886 = vmatprep.subr.bf16.mxu1 %v1021_v5  ;;  %901 = vmatpush3.bf16.msra.mxu0 %v1084_v6 }
   0x9   :  { %902 = vmatprep.subr.bf16.mxu0 %v1021_v5  ;;  %904 = vmatprep.mubr.msk.bf16.mxu0 %vm1022_vm1, %v1021_v5 }
   0xb   :  { %887 = vmatpush3.bf16.msra.mxu1 %v1093_v7 }
   0xc   :  { %892 = vmatprep.subr.bf16.mxu1 %v1021_v5  ;;  %903 = vmatpush3.bf16.msra.mxu0 %v1093_v7 }
   0xd   :  { %916 = vmatprep.subr.bf16.mxu0 %v1021_v5 }
   0xe   :  { %889 = vmatmul.mubr.msk.bf16.vlgmr.msra.gmra.mrb[4].mxu1 %vm148_vm2, %v163_v9 }
   0xf   :  { %893 = vmatpush3.bf16.msra.mxu1 %v1084_v6  ;;  %896 = vmatprep.mubr.msk.bf16.mxu1 %vm1022_vm1, %v1021_v5 }
  0x10   :  { %894 = vmatprep.subr.bf16.mxu1 %v1021_v5 }
  0x13   :  { %895 = vmatpush3.bf16.msra.mxu1 %v1093_v7 }
  0x14   :  { %908 = vmatprep.subr.bf16.mxu1 %v1021_v5 }
  0xd9   :  { %v878_v11 = vpop.f32.mrb[0].mxu0  ;;  %v882_v12 = vpop.f32.mrb[0].mxu1 }
  0xda   :  { %v126_v13 = vadd.f32 %v878_v11, %v812_v10  ;;  %v142_v14 = vadd.f32 %v882_v12, %v812_v10  ;;  %v117_v15 = vpop.f32.mrb[1].mxu0  ;;  %v133_v16 = vpop.f32.mrb[1].mxu1 }
  0xdb   :  { %v118_v17 = vadd.f32 %v812_v10, %v117_v15  ;;  %v134_v18 = vadd.f32 %v812_v10, %v133_v16  ;;  %v879_v19 = vpop.f32.mrb[2].mxu0  ;;  %v883_v20 = vpop.f32.mrb[2].mxu1 }
  0xdc   :  { %151 = vst.msk [vmem:[#allocation2 + $0x10] sm:$0xff] %vm148_vm2, %v126_v13  ;;  %155 = vst.msk [vmem:[#allocation2 + $0x30] sm:$0xff] %vm148_vm2, %v142_v14  ;;  %v129_v21 = vadd.f32 %v879_v19, %v812_v10  ;;  %v145_v22 = vadd.f32 %v883_v20, %v812_v10  ;;  %v120_v23 = vpop.f32.mrb[3].mxu0  ;;  %v136_v24 = vpop.f32.mrb[3].mxu1 }
  0xdd   :  { %149 = vst.msk [vmem:[#allocation2] sm:$0xff] %vm148_vm2, %v118_v17  ;;  %153 = vst.msk [vmem:[#allocation2 + $0x20] sm:$0xff] %vm148_vm2, %v134_v18  ;;  %v121_v25 = vadd.f32 %v812_v10, %v120_v23  ;;  %v137_v26 = vadd.f32 %v812_v10, %v136_v24 }
  0xde   :  { %152 = vst.msk [vmem:[#allocation2 + $0x18] sm:$0xff] %vm148_vm2, %v129_v21  ;;  %156 = vst.msk [vmem:[#allocation2 + $0x38] sm:$0xff] %vm148_vm2, %v145_v22 }
  0xdf   :  { %150 = vst.msk [vmem:[#allocation2 + $0x8] sm:$0xff] %vm148_vm2, %v121_v25  ;;  %154 = vst.msk [vmem:[#allocation2 + $0x28] sm:$0xff] %vm148_vm2, %v137_v26 }
  0xe1   :  { %v213_v27 = vpop.f32.mrb[4].mxu1 }
  0xe2   :  { %v890_v28 = vpop.f32.mrb[5].mxu1 }
  0xe3   :  { %v216_v29 = vpop.f32.mrb[6].mxu1  ;;  %v272_v43 = vld [vmem:[#allocation2 + $0x10] sm:$0xff]  ;;  %v1179_v28 = vld [vmem:[%s1310_s6] ss:$0 sm:$0xff] }
  0xe4   :  { %v162_v30 = vld [vmem:[#allocation2] sm:$0xff]  ;;  %v891_v31 = vpop.f32.mrb[7].mxu1  ;;  %v468_v22 = vld [vmem:[#allocation2 + $0x30] sm:$0xff] }
  0xe5   :  { %v219_v32 = vadd.f32 %v213_v27, %v162_v30  ;;  %v321_v51 = vld [vmem:[#allocation2 + $0x18] sm:$0xff]  ;;  %v370_v59 = vld [vmem:[#allocation2 + $0x20] sm:$0xff] }
  0xe6   :  { %v223_v35 = vld [vmem:[#allocation2 + $0x8] sm:$0xff] }
  0xe7   :  { %973 = vtanh.f32 %v219_v32  ;;  %v419_v4 = vld [vmem:[#allocation2 + $0x28] sm:$0xff] }
  0xf1   :  { %v974_v33 = vpop.eup %973 }
  0xf2   :  { %221 = vst.msk [vmem:[#allocation2] sm:$0xff] %vm148_vm2, %v974_v33  ;;  %v224_v34 = vpack.c.bf16 %v974_v33, %v974_v33 }
  0xf4   :  { %897 = vmatmul.mubr.msk.bf16.vlgmr.msra.gmra.mrb[8].mxu1 %vm148_vm2, %v224_v34 }
  0xf5   :  { %909 = vmatpush3.bf16.msra.mxu1 %v1084_v6  ;;  %912 = vmatprep.mubr.msk.bf16.mxu1 %vm1022_vm1, %v1021_v5 }
  0xf6   :  { %910 = vmatprep.subr.bf16.mxu1 %v1021_v5 }
  0xf9   :  { %911 = vmatpush3.bf16.msra.mxu1 %v1093_v7 }
  0xfa   :  { %924 = vmatprep.subr.bf16.mxu1 %v1021_v5 }
 0x1c7   :  { %v262_v36 = vpop.f32.mrb[8].mxu1 }
 0x1c8   :  { %v268_v37 = vadd.f32 %v262_v36, %v223_v35  ;;  %v898_v38 = vpop.f32.mrb[9].mxu1 }
 0x1c9   :  { %v265_v39 = vpop.f32.mrb[10].mxu1 }
 0x1ca   :  { %975 = vtanh.f32 %v268_v37  ;;  %v899_v40 = vpop.f32.mrb[11].mxu1 }
 0x1d4   :  { %v976_v41 = vpop.eup %975 }
 0x1d5   :  { %270 = vst.msk [vmem:[#allocation2 + $0x8] sm:$0xff] %vm148_vm2, %v976_v41  ;;  %v273_v42 = vpack.c.bf16 %v976_v41, %v976_v41 }
 0x1d7   :  { %905 = vmatmul.mubr.msk.bf16.vlgmr.msra.gmra.mrb[4].mxu0 %vm148_vm2, %v273_v42 }
 0x1d8   :  { %917 = vmatpush3.bf16.msra.mxu0 %v1084_v6  ;;  %920 = vmatprep.mubr.msk.bf16.mxu0 %vm1022_vm1, %v1021_v5 }
 0x1d9   :  { %918 = vmatprep.subr.bf16.mxu0 %v1021_v5 }
 0x1dc   :  { %919 = vmatpush3.bf16.msra.mxu0 %v1093_v7 }
 0x1dd   :  { %932 = vmatprep.subr.bf16.mxu0 %v1021_v5 }
 0x2aa   :  { %v311_v44 = vpop.f32.mrb[4].mxu0 }
 0x2ab   :  { %v317_v45 = vadd.f32 %v311_v44, %v272_v43  ;;  %v906_v46 = vpop.f32.mrb[5].mxu0 }
 0x2ac   :  { %v314_v47 = vpop.f32.mrb[6].mxu0 }
 0x2ad   :  { %977 = vtanh.f32 %v317_v45  ;;  %v907_v48 = vpop.f32.mrb[7].mxu0 }
 0x2b7   :  { %v978_v49 = vpop.eup %977 }
 0x2b8   :  { %319 = vst.msk [vmem:[#allocation2 + $0x10] sm:$0xff] %vm148_vm2, %v978_v49  ;;  %v322_v50 = vpack.c.bf16 %v978_v49, %v978_v49 }
 0x2ba   :  { %913 = vmatmul.mubr.msk.bf16.vlgmr.msra.gmra.mrb[12].mxu1 %vm148_vm2, %v322_v50 }
 0x2bb   :  { %925 = vmatpush3.bf16.msra.mxu1 %v1084_v6  ;;  %928 = vmatprep.mubr.msk.bf16.mxu1 %vm1022_vm1, %v1021_v5 }
 0x2bc   :  { %926 = vmatprep.subr.bf16.mxu1 %v1021_v5 }
 0x2bf   :  { %927 = vmatpush3.bf16.msra.mxu1 %v1093_v7  ;;  %v567_v17 = vld [vmem:[#allocation2 + $0x10] sm:$0xff] }
 0x2c0   :  { %940 = vmatprep.subr.bf16.mxu1 %v1021_v5 }
 0x38d   :  { %v360_v52 = vpop.f32.mrb[12].mxu1 }
 0x38e   :  { %v366_v53 = vadd.f32 %v360_v52, %v321_v51  ;;  %v914_v54 = vpop.f32.mrb[13].mxu1 }
 0x38f   :  { %v363_v55 = vpop.f32.mrb[14].mxu1  ;;  %v677_v54 = vlaneseq }
 0x390   :  { %979 = vtanh.f32 %v366_v53  ;;  %v915_v56 = vpop.f32.mrb[15].mxu1 }
 0x39a   :  { %v980_v57 = vpop.eup %979 }
 0x39b   :  { %368 = vst.msk [vmem:[#allocation2 + $0x18] sm:$0xff] %vm148_vm2, %v980_v57  ;;  %v371_v58 = vpack.c.bf16 %v980_v57, %v980_v57 }
 0x39d   :  { %921 = vmatmul.mubr.msk.bf16.vlgmr.msra.gmra.mrb[8].mxu0 %vm148_vm2, %v371_v58 }
 0x39e   :  { %933 = vmatpush3.bf16.msra.mxu0 %v1084_v6  ;;  %936 = vmatprep.mubr.msk.bf16.mxu0 %vm1022_vm1, %v1021_v5 }
 0x39f   :  { %934 = vmatprep.subr.bf16.mxu0 %v1021_v5 }
 0x3a2   :  { %935 = vmatpush3.bf16.msra.mxu0 %v1093_v7  ;;  %v568_v16 = vld [vmem:[#allocation2 + $0x18] sm:$0xff] }
 0x3a3   :  { %948 = vmatprep.subr.bf16.mxu0 %v971_v3  ;;  %v574_v20 = vpack.c.bf16 %v568_v16, %v567_v17 }
 0x470   :  { %v409_v60 = vpop.f32.mrb[8].mxu0 }
 0x471   :  { %v415_v61 = vadd.f32 %v409_v60, %v370_v59  ;;  %v922_v62 = vpop.f32.mrb[9].mxu0  ;;  %v1199_v59 = vand.u32 127, %v677_v54 }
 0x472   :  { %v412_v63 = vpop.f32.mrb[10].mxu0 }
 0x473   :  { %981 = vtanh.f32 %v415_v61  ;;  %v923_v0 = vpop.f32.mrb[11].mxu0  ;;  %vm679_vm3 = vcmp.lt.s32.totalorder %v1199_v59, 16 }
 0x47d   :  { %v982_v1 = vpop.eup %981 }
 0x47e   :  { %417 = vst.msk [vmem:[#allocation2 + $0x20] sm:$0xff] %vm148_vm2, %v982_v1  ;;  %v420_v2 = vpack.c.bf16 %v982_v1, %v982_v1 }
 0x480   :  { %929 = vmatmul.mubr.msk.bf16.vlgmr.msra.gmra.mrb[16].mxu1 %vm148_vm2, %v420_v2 }
 0x481   :  { %941 = vmatpush3.bf16.msra.mxu1 %v1084_v6  ;;  %944 = vmatprep.mubr.msk.bf16.mxu1 %vm1022_vm1, %v1021_v5  ;;  %v566_v6 = vld [vmem:[#allocation2 + $0x8] sm:$0xff] }
 0x482   :  { %942 = vmatprep.subr.bf16.mxu1 %v1021_v5  ;;  %v565_v5 = vld [vmem:[#allocation2] sm:$0xff] }
 0x483   :  { %v573_v15 = vpack.c.bf16 %v566_v6, %v565_v5 }
 0x485   :  { %943 = vmatpush3.bf16.msra.mxu1 %v1093_v7  ;;  %v972_v7 = vld [vmem:[%s1309_s5 + $0x8] sm:$0xff]   ;;  %v569_v18 = vld [vmem:[#allocation2 + $0x20] sm:$0xff] }
 0x553   :  { %v458_v8 = vpop.f32.mrb[16].mxu1 }
 0x554   :  { %v464_v9 = vadd.f32 %v458_v8, %v419_v4  ;;  %v930_v10 = vpop.f32.mrb[17].mxu1 }
 0x555   :  { %v461_v11 = vpop.f32.mrb[18].mxu1 }
 0x556   :  { %983 = vtanh.f32 %v464_v9  ;;  %v931_v12 = vpop.f32.mrb[19].mxu1 }
 0x560   :  { %v984_v13 = vpop.eup %983 }
 0x561   :  { %466 = vst.msk [vmem:[#allocation2 + $0x28] sm:$0xff] %vm148_vm2, %v984_v13  ;;  %v469_v14 = vpack.c.bf16 %v984_v13, %v984_v13 }
 0x563   :  { %937 = vmatmul.mubr.msk.bf16.vlgmr.msra.gmra.mrb[12].mxu0 %vm148_vm2, %v469_v14 }
 0x564   :  { %949 = vmatpush3.bf16.msra.mxu0 %v971_v3  ;;  %952 = vmatprep.mubr.msk.bf16.mxu0 %vm148_vm2, %v573_v15 }
 0x565   :  { %950 = vmatprep.subr.bf16.mxu0 %v972_v7 }
 0x568   :  { %951 = vmatpush3.bf16.msra.mxu0 %v972_v7  ;;  %v570_v19 = vld [vmem:[#allocation2 + $0x28] sm:$0xff] }
 0x569   :  { %v575_v21 = vpack.c.bf16 %v570_v19, %v569_v18 }
 0x56b   :  { %953 = vmatmul.mubr.msk.bf16.vlgmr.msra.gmra.mrb[16].mxu0 %vm148_vm2, %v574_v20 }
 0x56c   :  { %956 = vmatprep.mubr.msk.bf16.mxu0 %vm148_vm2, %v575_v21 }
 0x636   :  { %v507_v23 = vpop.f32.mrb[12].mxu0 }
 0x637   :  { %v513_v24 = vadd.f32 %v507_v23, %v468_v22  ;;  %v938_v25 = vpop.f32.mrb[13].mxu0 }
 0x638   :  { %v510_v26 = vpop.f32.mrb[14].mxu0 }
 0x639   :  { %985 = vtanh.f32 %v513_v24  ;;  %v939_v27 = vpop.f32.mrb[15].mxu0 }
 0x63e   :  { %v954_v29 = vpop.f32.mrb[16].mxu0 }
 0x63f   :  { %v1182_v30 = vadd.f32 %v954_v29, %v1179_v28  ;;  %v646_v31 = vpop.f32.mrb[17].mxu0 }
 0x640   :  { %v1185_v32 = vadd.f32 %v1179_v28, %v646_v31  ;;  %v955_v33 = vpop.f32.mrb[18].mxu0 }
 0x641   :  { %v690_v34 = vmin.f32 %v1182_v30, 20.0  ;;  %v1189_v35 = vadd.f32 %v955_v33, %v1179_v28  ;;  %v649_v36 = vpop.f32.mrb[19].mxu0  ;;  %vm682_vm4 = vcmp.gt.f32.partialorder %v1182_v30, 20.0 }
 0x642   :  { %v688_v37 = vmin.f32 %v1185_v32, 20.0  ;;  %v1193_v38 = vadd.f32 %v1179_v28, %v649_v36  ;;  %vm680_vm5 = vcmp.gt.f32.partialorder %v1185_v32, 20.0 }
 0x643   :  { %v986_v39 = vpop.eup %985  ;;  %v700_v40 = vmul.f32 1.442695, %v690_v34  ;;  %v691_v41 = vmin.f32 %v1189_v35, 20.0  ;;  %vm683_vm6 = vcmp.gt.f32.partialorder %v1189_v35, 20.0 }
 0x644   :  { %515 = vst.msk [vmem:[#allocation2 + $0x30] sm:$0xff] %vm148_vm2, %v986_v39  ;;  %v696_v42 = vmul.f32 1.442695, %v688_v37  ;;  %v689_v43 = vmin.f32 %v1193_v38, 20.0  ;;  %v518_v44 = vpack.c.bf16 %v986_v39, %v986_v39  ;;  %vm681_vm11 = vcmp.gt.f32.partialorder %v1193_v38, 20.0 }
 0x645   :  { %987 = vpow2.f32 %v700_v40  ;;  %v702_v45 = vmul.f32 1.442695, %v691_v41 }
 0x646   :  { %989 = vpow2.f32 %v696_v42  ;;  %v698_v46 = vmul.f32 1.442695, %v689_v43  ;;  %945 = vmatmul.mubr.msk.bf16.vlgmr.msra.gmra.mrb[20].mxu1 %vm148_vm2, %v518_v44 }
 0x647   :  { %991 = vpow2.f32 %v702_v45 }
 0x648   :  { %993 = vpow2.f32 %v698_v46 }
 0x64b   :  { %v571_v37 = vld [vmem:[#allocation2 + $0x30] sm:$0xff] }
 0x64f   :  { %v988_v47 = vpop.eup %987 }
 0x650   :  { %v990_v48 = vpop.eup %989  ;;  %v730_v49 = vadd.f32 1.0, %v988_v47  ;;  %v733_v56 = vmul.f32 -0.5, %v988_v47  ;;  %v736_v62 = vand.u32 2147483647, %v988_v47 }
 0x651   :  { %v992_v50 = vpop.eup %991  ;;  %v712_v51 = vadd.f32 1.0, %v990_v48  ;;  %v715_v57 = vmul.f32 -0.5, %v990_v48  ;;  %v718_v0 = vand.u32 2147483647, %v990_v48 }
 0x652   :  { %v994_v52 = vpop.eup %993  ;;  %995 = vlog2.f32 %v730_v49  ;;  %v739_v53 = vadd.f32 1.0, %v992_v50  ;;  %v742_v58 = vmul.f32 -0.5, %v992_v50  ;;  %v734_v61 = vadd.f32 1.0, %v733_v56 }
 0x653   :  { %997 = vlog2.f32 %v712_v51  ;;  %v721_v55 = vadd.f32 1.0, %v994_v52  ;;  %v724_v60 = vmul.f32 -0.5, %v994_v52  ;;  %v716_v63 = vadd.f32 1.0, %v715_v57 }
 0x654   :  { %999 = vlog2.f32 %v739_v53  ;;  %v743_v1 = vadd.f32 1.0, %v742_v58  ;;  %v745_v3 = vand.u32 2147483647, %v992_v50  ;;  %v735_v10 = vmul.f32 %v988_v47, %v734_v61 }
 0x655   :  { %1001 = vlog2.f32 %v721_v55  ;;  %v725_v4 = vadd.f32 1.0, %v724_v60  ;;  %vm737_vm7 = vcmp.lt.f32.partialorder %v736_v62, 0.0004427343  ;;  %v717_v6 = vmul.f32 %v990_v48, %v716_v63 }
 0x656   :  { %v727_v13 = vand.u32 2147483647, %v994_v52  ;;  %vm719_vm8 = vcmp.lt.f32.partialorder %v718_v0, 0.0004427343  ;;  %v744_v7 = vmul.f32 %v992_v50, %v743_v1  ;;  %vm746_vm9 = vcmp.lt.f32.partialorder %v745_v3, 0.0004427343 }
 0x657   :  { %v726_v18 = vmul.f32 %v994_v52, %v725_v4 }
 0x658   :  { %vm728_vm10 = vcmp.lt.f32.partialorder %v727_v13, 0.0004427343 }
 0x65c   :  { %v996_v2 = vpop.eup %995 }
 0x65d   :  { %v998_v8 = vpop.eup %997  ;;  %v732_v9 = vmul.f32 0.6931472, %v996_v2 }
 0x65e   :  { %v1000_v11 = vpop.eup %999  ;;  %v714_v12 = vmul.f32 0.6931472, %v998_v8 }
 0x65f   :  { %v738_v14 = vsel %vm737_vm7, %v735_v10, %v732_v9  ;;  %v741_v5 = vmul.f32 0.6931472, %v1000_v11  ;;  %v1002_v15 = vpop.eup %1001 }
 0x660   :  { %v786_v16 = vsel %vm682_vm4, %v1182_v30, %v738_v14  ;;  %v720_v17 = vsel %vm719_vm8, %v717_v6, %v714_v12  ;;  %v723_v22 = vmul.f32 0.6931472, %v1002_v15 }
 0x661   :  { %v794_v19 = vsel %vm679_vm3, %v1182_v30, %v786_v16  ;;  %v784_v20 = vsel %vm680_vm5, %v1185_v32, %v720_v17  ;;  %v747_v21 = vsel %vm746_vm9, %v744_v7, %v741_v5  ;;  %v517_v30 = vld [vmem:[#allocation2 + $0x38] sm:$0xff] }
 0x662   :  { %802 = vst.msk [vmem:[%s1311_s7 + $0x10] sm:$0xff] %vm148_vm2, %v794_v19  ;;  %v792_v23 = vsel %vm679_vm3, %v1185_v32, %v784_v20  ;;  %v787_v24 = vsel %vm683_vm6, %v1189_v35, %v747_v21  ;;  %v729_v26 = vsel %vm728_vm10, %v726_v18, %v723_v22 }
 0x663   :  { %800 = vst.msk [vmem:[%s1311_s7] sm:$0xff] %vm148_vm2, %v792_v23  ;;  %v795_v25 = vsel %vm679_vm3, %v1189_v35, %v787_v24  ;;  %v785_v27 = vsel %vm681_vm11, %v1193_v38, %v729_v26 }
 0x664   :  { %803 = vst.msk [vmem:[%s1311_s7 + $0x18] sm:$0xff] %vm148_vm2, %v795_v25  ;;  %v793_v29 = vsel %vm679_vm3, %v1193_v38, %v785_v27 }
 0x665   :  { %801 = vst.msk [vmem:[%s1311_s7 + $0x8] sm:$0xff] %vm148_vm2, %v793_v29 }
 0x719   :  { %v556_v31 = vpop.f32.mrb[20].mxu1 }
 0x71a   :  { %v562_v32 = vadd.f32 %v556_v31, %v517_v30  ;;  %v946_v33 = vpop.f32.mrb[21].mxu1 }
 0x71b   :  { %v559_v34 = vpop.f32.mrb[22].mxu1 }
 0x71c   :  { %1003 = vtanh.f32 %v562_v32  ;;  %v947_v35 = vpop.f32.mrb[23].mxu1 }
 0x726   :  { %v1004_v36 = vpop.eup %1003 }
 0x727   :  { %564 = vst.msk [vmem:[#allocation2 + $0x38] sm:$0xff] %vm148_vm2, %v1004_v36 }
 0x72e   :  { %v572_v39 = vld [vmem:[#allocation2 + $0x38] sm:$0xff] }
 0x72f   :  { %v576_v40 = vpack.c.bf16 %v572_v39, %v571_v37 }
 0x731   :  { %957 = vmatmul.mubr.msk.bf16.gmra.mrb[20].mxu0 %vm148_vm2, %v576_v40 }
 0x804   :  { %v958_v38 = vpop.f32.mrb[20].mxu0 }
 0x805   :  { %v1247_v41 = vadd.f32 %v958_v38, %v1179_v28  ;;  %v662_v42 = vpop.f32.mrb[21].mxu0 }
 0x806   :  { %v1250_v43 = vadd.f32 %v1179_v28, %v662_v42  ;;  %v959_v44 = vpop.f32.mrb[22].mxu0 }
 0x807   :  { %v694_v45 = vmin.f32 %v1247_v41, 20.0  ;;  %v1254_v46 = vadd.f32 %v959_v44, %v1179_v28  ;;  %v665_v47 = vpop.f32.mrb[23].mxu0  ;;  %vm686_vm12 = vcmp.gt.f32.partialorder %v1247_v41, 20.0 }
 0x808   :  { %v692_v48 = vmin.f32 %v1250_v43, 20.0  ;;  %v1258_v49 = vadd.f32 %v1179_v28, %v665_v47  ;;  %vm684_vm13 = vcmp.gt.f32.partialorder %v1250_v43, 20.0 }
 0x809   :  { %v708_v50 = vmul.f32 1.442695, %v694_v45  ;;  %v695_v51 = vmin.f32 %v1254_v46, 20.0  ;;  %vm687_vm14 = vcmp.gt.f32.partialorder %v1254_v46, 20.0 }
 0x80a   :  { %v704_v52 = vmul.f32 1.442695, %v692_v48  ;;  %v693_v53 = vmin.f32 %v1258_v49, 20.0  ;;  %vm685_vm5 = vcmp.gt.f32.partialorder %v1258_v49, 20.0 }
 0x80b   :  { %1005 = vpow2.f32 %v708_v50  ;;  %v710_v54 = vmul.f32 1.442695, %v695_v51 }
 0x80c   :  { %1007 = vpow2.f32 %v704_v52  ;;  %v706_v55 = vmul.f32 1.442695, %v693_v53 }
 0x80d   :  { %1009 = vpow2.f32 %v710_v54 }
 0x80e   :  { %1011 = vpow2.f32 %v706_v55 }
 0x815   :  { %v1006_v56 = vpop.eup %1005 }
 0x816   :  { %v1008_v57 = vpop.eup %1007  ;;  %v766_v58 = vadd.f32 1.0, %v1006_v56  ;;  %v769_v0 = vmul.f32 -0.5, %v1006_v56  ;;  %v772_v8 = vand.u32 2147483647, %v1006_v56 }
 0x817   :  { %v1010_v60 = vpop.eup %1009  ;;  %v748_v61 = vadd.f32 1.0, %v1008_v57  ;;  %v751_v1 = vmul.f32 -0.5, %v1008_v57  ;;  %v754_v10 = vand.u32 2147483647, %v1008_v57 }
 0x818   :  { %v1012_v62 = vpop.eup %1011  ;;  %1013 = vlog2.f32 %v766_v58  ;;  %v775_v28 = vadd.f32 1.0, %v1010_v60  ;;  %v778_v2 = vmul.f32 -0.5, %v1010_v60  ;;  %v770_v4 = vadd.f32 1.0, %v769_v0 }
 0x819   :  { %1015 = vlog2.f32 %v748_v61  ;;  %v757_v63 = vadd.f32 1.0, %v1012_v62  ;;  %v760_v3 = vmul.f32 -0.5, %v1012_v62  ;;  %v752_v9 = vadd.f32 1.0, %v751_v1 }
 0x81a   :  { %1017 = vlog2.f32 %v775_v28  ;;  %v779_v11 = vadd.f32 1.0, %v778_v2  ;;  %v781_v6 = vand.u32 2147483647, %v1010_v60  ;;  %v771_v7 = vmul.f32 %v1006_v56, %v770_v4 }
 0x81b   :  { %1019 = vlog2.f32 %v757_v63  ;;  %v761_v13 = vadd.f32 1.0, %v760_v3  ;;  %vm773_vm15 = vcmp.lt.f32.partialorder %v772_v8, 0.0004427343  ;;  %v753_v17 = vmul.f32 %v1008_v57, %v752_v9 }
 0x81c   :  { %v763_v18 = vand.u32 2147483647, %v1012_v62  ;;  %vm755_vm0 = vcmp.lt.f32.partialorder %v754_v10, 0.0004427343  ;;  %v780_v21 = vmul.f32 %v1010_v60, %v779_v11  ;;  %vm782_vm1 = vcmp.lt.f32.partialorder %v781_v6, 0.0004427343 }
 0x81d   :  { %v762_v25 = vmul.f32 %v1012_v62, %v761_v13 }
 0x81e   :  { %vm764_vm4 = vcmp.lt.f32.partialorder %v763_v18, 0.0004427343 }
 0x822   :  { %v1014_v12 = vpop.eup %1013 }
 0x823   :  { %v1016_v14 = vpop.eup %1015  ;;  %v768_v5 = vmul.f32 0.6931472, %v1014_v12 }
 0x824   :  { %v1018_v15 = vpop.eup %1017  ;;  %v750_v16 = vmul.f32 0.6931472, %v1016_v14 }
 0x825   :  { %v774_v19 = vsel %vm773_vm15, %v771_v7, %v768_v5  ;;  %v777_v20 = vmul.f32 0.6931472, %v1018_v15  ;;  %v1020_v22 = vpop.eup %1019 }
 0x826   :  { %v790_v23 = vsel %vm686_vm12, %v1247_v41, %v774_v19  ;;  %v756_v24 = vsel %vm755_vm0, %v753_v17, %v750_v16  ;;  %v759_v30 = vmul.f32 0.6931472, %v1020_v22 }
 0x827   :  { %v798_v26 = vsel %vm679_vm3, %v1247_v41, %v790_v23  ;;  %v788_v27 = vsel %vm684_vm13, %v1250_v43, %v756_v24  ;;  %v783_v29 = vsel %vm782_vm1, %v780_v21, %v777_v20 }
 0x828   :  { %806 = vst.msk [vmem:[%s1311_s7 + $0x30] sm:$0xff] %vm148_vm2, %v798_v26  ;;  %v796_v31 = vsel %vm679_vm3, %v1250_v43, %v788_v27  ;;  %v791_v32 = vsel %vm687_vm14, %v1254_v46, %v783_v29  ;;  %v765_v34 = vsel %vm764_vm4, %v762_v25, %v759_v30 }
 0x829   :  { %804 = vst.msk [vmem:[%s1311_s7 + $0x20] sm:$0xff] %vm148_vm2, %v796_v31  ;;  %v799_v33 = vsel %vm679_vm3, %v1254_v46, %v791_v32  ;;  %v789_v35 = vsel %vm685_vm5, %v1258_v49, %v765_v34 }
 0x82a   :  { %807 = vst.msk [vmem:[%s1311_s7 + $0x38] sm:$0xff] %vm148_vm2, %v799_v33  ;;  %v797_v36 = vsel %vm679_vm3, %v1258_v49, %v789_v35 }
 0x82b   :  { %805 = vst.msk [vmem:[%s1311_s7 + $0x28] sm:$0xff] %vm148_vm2, %v797_v36 }

</bundles_post_ra>
